<compile_context>
chip_gen: v5e
topology: v5e:2x2
jax: 0.10.0
libtpu: 0.0.40
codegen_flags: <defaults>
</compile_context>

<pallas_src>
import jax
import jax.numpy as jnp
from jax.experimental import pallas as pl
from jax.experimental.pallas import tpu as pltpu


def linear_sub_kernel(x_ref, wt_ref, beff_ref, o_ref):
    # x: (B, IN), wt: (IN, OUT), beff: (1, OUT)  -- all fully resident in VMEM
    y = jnp.dot(x_ref[...], wt_ref[...], preferred_element_type=jnp.float32)
    o_ref[...] = (y + beff_ref[...]).astype(o_ref.dtype)


def init_params(weight, bias, other_scalar):
    """One-time parameter prep (hoisted out of the per-call hot path).

    weight: (OUT, IN) in nn.Linear layout; bias: (OUT,); other: scalar.
    Returns (wt, b_eff): weight pre-transposed to (IN, OUT) and an effective
    bias with `- other` already folded in.
    """
    wt = jnp.asarray(weight, jnp.float32).T                       # (IN, OUT)
    b_eff = (jnp.asarray(bias, jnp.float32)
             - jnp.asarray(other_scalar, jnp.float32)).reshape(1, -1)
    return wt, b_eff


@jax.jit
def model_forward(x, wt, b_eff):
    """x: (B, IN); wt: (IN, OUT); b_eff: (1, OUT).  Returns (B, OUT)."""
    B, _ = x.shape
    OUT = wt.shape[1]
    return pl.pallas_call(
        linear_sub_kernel,
        out_shape=jax.ShapeDtypeStruct((B, OUT), jnp.float32),
        in_specs=[
            pl.BlockSpec(memory_space=pltpu.MemorySpace.VMEM),   # x
            pl.BlockSpec(memory_space=pltpu.MemorySpace.VMEM),   # weight (IN, OUT)
            pl.BlockSpec(memory_space=pltpu.MemorySpace.VMEM),   # bias - other
        ],
        out_specs=pl.BlockSpec(memory_space=pltpu.MemorySpace.VMEM),
    )(x, wt, b_eff)


if __name__ == "__main__":
    key = jax.random.PRNGKey(0)
    k_x, k_w, k_b = jax.random.split(key, 3)

    IN, OUT, B = 10, 100, 1

    # Deterministic parameter init mimicking nn.Linear (uniform in +/- 1/sqrt(IN))
    bound = 1.0 / (IN ** 0.5)
    weight = jax.random.uniform(k_w, (OUT, IN), jnp.float32, -bound, bound)
    bias = jax.random.uniform(k_b, (OUT,), jnp.float32, -bound, bound)
    other = 1.0  # the `other` operand subtracted in forward

    x1 = jax.random.normal(k_x, (B, IN), jnp.float32)

    # One-time prep (would live at module-init time in a real model).
    wt, b_eff = jax.block_until_ready(init_params(weight, bias, other))

    out = model_forward(x1, wt, b_eff)
    jax.block_until_ready(out)

    # Reference check in plain JAX
    ref = x1 @ weight.T + bias - other
    assert out.shape == (B, OUT)
    assert jnp.allclose(out, ref, atol=1e-5, rtol=1e-5)

    print("KERNEL_OK")
</pallas_src>

<mosaic_0001>
module attributes {stable_mosaic.version = 11 : i64} {
  func.func @linear_sub_kernel(%arg0: memref<1x10xf32, #tpu.memory_space<vmem>>, %arg1: memref<10x100xf32, #tpu.memory_space<vmem>>, %arg2: memref<1x100xf32, #tpu.memory_space<vmem>>, %arg3: memref<1x100xf32, #tpu.memory_space<vmem>>) attributes {dimension_semantics = [], scalar_prefetch = 0 : i64, scratch_operands = 0 : i64, tpu.core_type = #tpu.core_type<tc>} {
    %c0 = arith.constant 0 : index
    %c0_0 = arith.constant 0 : index
    %0 = vector.load %arg0[%c0, %c0_0] : memref<1x10xf32, #tpu.memory_space<vmem>>, vector<1x10xf32>
    %c0_1 = arith.constant 0 : index
    %c0_2 = arith.constant 0 : index
    %1 = vector.load %arg1[%c0_1, %c0_2] : memref<10x100xf32, #tpu.memory_space<vmem>>, vector<10x100xf32>
    %cst = arith.constant dense<0.000000e+00> : vector<1x100xf32>
    %2 = tpu.matmul %0, %1, %cst {dimension_numbers = #tpu.dot_dimension_numbers<[1], [0], [0], [1], [0, 0, 1, 1], [], []>} : vector<1x10xf32>, vector<10x100xf32>, vector<1x100xf32> -> vector<1x100xf32>
    %c0_3 = arith.constant 0 : index
    %c0_4 = arith.constant 0 : index
    %3 = vector.load %arg2[%c0_3, %c0_4] : memref<1x100xf32, #tpu.memory_space<vmem>>, vector<1x100xf32>
    %4 = arith.addf %2, %3 : vector<1x100xf32>
    %c0_5 = arith.constant 0 : index
    %c0_6 = arith.constant 0 : index
    %5 = vector.load %arg3[%c0_5, %c0_6] : memref<1x100xf32, #tpu.memory_space<vmem>>, vector<1x100xf32>
    tpu.vector_store %arg3[%c0_5, %c0_6], %4 {strides = array<i32>} : memref<1x100xf32, #tpu.memory_space<vmem>>, vector<1x100xf32>,
    return
  }
}

</mosaic_0001>

<bundles_post_ra>
// kernel: model_forward.1
= control target key start
LH: loop header
LB: loop body
LE: loop exit
PB: predicated region body
PF: predicated region fallthrough
CT: control target
= control target key end

     0   :  { %8 = vsyncpa [#allocation3], 0  ;;  %s219_s0 = inlined_call_operand.hbm [shape: f32[1,10], index: 0, kind: input, shape index: {}]   ;;  %s220_s1 = inlined_call_operand.hbm [shape: f32[10,100], index: 1, kind: input, shape index: {}]   ;;  %s221_s2 = inlined_call_operand.vmem [shape: f32[1,100], index: 2, kind: input, shape index: {}]   ;;  %s222_s3 = inlined_call_operand.hbm [shape: f32[1,100], index: 3, kind: output, shape index: {}]  }
   0x1   :  { %9 = vsyncpa [#allocation6], 0 }
   0x2   :  { %10 = vsyncpa [#allocation4], 0  ;;  %s16_s14 = sshll.u32 %s219_s0, 4  ;;  %s182_s15 = smov [#allocation2]   ;;  %s17_s14 = int_to_ptr.hbm [resolvable:$true] %s16_s14 }
   0x3   :  { %s18_s16 = sshll.u32 %s182_s15, 4  ;;  %s26_s19 = sshll.u32 %s220_s1, 4  ;;  %s19_s16 = int_to_ptr.vmem [resolvable:$true] %s18_s16  ;;  %s27_s19 = int_to_ptr.hbm [resolvable:$true] %s26_s19 }
   0x4   :  { %21 = dma.hbm_to_vmem [thread:$0]  %s17_s14, 16, %s19_s16, [#allocation3]  }
   0x5   :  { %s183_s20 = smov [#allocation5]   ;;  %s184_s22 = smov 128  }
   0x6   :  { %s28_s21 = sshll.u32 %s183_s20, 4  ;;  %s185_s23 = smov 8   ;;  %s29_s21 = int_to_ptr.vmem [resolvable:$true] %s28_s21 }
   0x7   :  { %34 = dma.hbm_to_vmem [thread:$0]  %s27_s19, 256, %s29_s21, [#allocation6], %s184_s22, %s184_s22, %s185_s23  }
   0x8   :  { %176 = dma.done.wait [#allocation3], 16  }
   0x9   :  { %177 = vsyncadd [#allocation3], 4294967280 }
   0xa   :  { %178 = dma.done.wait [#allocation6], 256  }
   0xb   :  { %179 = vsyncadd [#allocation6], 4294967040  ;;  %vm53_vm0 = vcmask 1041408   ;;  %v47_v0 = vld [vmem:[#allocation5 + $0x8] sm:$0x3]  ;;  %v46_v1 = vld [vmem:[#allocation5] sm:$0xff] }
   0xc   :  { %97 = vmatpush.msk.msra.mxu0 %vm53_vm0, %v47_v0  ;;  %v45_v2 = vld [vmem:[#allocation2] sm:$0x1]  ;;  %vm49_vm1 = vcmask 80896   ;;  %s186_s24 = smov [#allocation7]   ;;  %s86_s28 = sshll.u32 %s222_s3, 4  ;;  %vm77_vm2 = vcmask 811008   ;;  %s87_s28 = int_to_ptr.hbm [resolvable:$true] %s86_s28 }
   0xd   :  { %v48_v3 = vld [vmem:[%s221_s2] sm:$0x1]  ;;  %s84_s25 = sshll.u32 %s186_s24, 4  ;;  %s85_s25 = int_to_ptr.vmem [resolvable:$true] %s84_s25 }
   0xe   :  { %72 = vmatpush.msra.mxu0 %v46_v1 }
   0xf   :  { %98 = vmatmul.msk.f32.vlgmr.msra.gmra.mxu0 %vm49_vm1, %v45_v2 }
  0x8c   :  { %v74_v4 = vpop.f32.mrf.mxu0 }
  0x8d   :  { %v75_v5 = vadd.f32 %v74_v4, %v48_v3 }
  0x8f   :  { %78 = vst.msk [vmem:[#allocation7] sm:$0x1] %vm77_vm2, %v75_v5 }
  0x90   :  { %89 = dma.vmem_to_hbm [thread:$0]  %s85_s25, 16, %s87_s28, [#allocation4]  }
  0x91   :  { %180 = dma.done.wait [#allocation4], 16  }
  0x92   :  { %181 = vsyncadd [#allocation4], 4294967280 }
  0x93   :  { %94 = vsyncpa [#allocation3], 1 }
  0x94   :  { %95 = vsyncpa [#allocation6], 1 }
  0x95   :  { %96 = vsyncpa [#allocation4], 1 }

</bundles_post_ra>
